<compile_context>
chip_gen: v5e
topology: v5e:2x2
jax: 0.10.0
libtpu: 0.0.40
codegen_flags: <defaults>
</compile_context>

<pallas_src>
import jax
import jax.numpy as jnp
import numpy as np
from jax import lax
from jax.experimental import pallas as pl
from jax.experimental.pallas import tpu as pltpu


def _round_up(x, m):
    return ((x + m - 1) // m) * m


def _orbit_collapse_kernel(i_tab_ref, j_tab_ref,
                           e_i_ref, e_j_ref,
                           lab_i_ref, lab_j_ref,
                           sq_i_ref, sq_j_ref,
                           out_ref):
    """One upper-triangle (i, j) tile of the masked pairwise-distance sum.

    i_tab_ref / j_tab_ref : SMEM scalar-prefetch tables (flattened
                            (num_fold * steps_per_fold,) int32 block indices)
    e_i_ref  : (t, D)  row-block embeddings
    e_j_ref  : (t, D)  column-block embeddings
    lab_i_ref: (t, 1)  row-block labels
    lab_j_ref: (1, t)  column-block labels
    sq_i_ref : (t, 1)  row-block squared norms (precomputed, f32)
    sq_j_ref : (1, t)  column-block squared norms (precomputed, f32)
    out_ref  : (1, 1, t) f32 per-row-block partial sums; resident across the
               contiguous run of tiles belonging to this row block.
    """
    p = pl.program_id(0)
    q = pl.program_id(1)
    idx = p * pl.num_programs(1) + q
    i = i_tab_ref[idx]
    j = j_tab_ref[idx]
    t = e_i_ref.shape[0]

    # Same-label mask (broadcast (t,1) == (1,t) -> (t,t)); computed before the
    # distance so (t,t) temporaries' lifetimes overlap as little as possible.
    same = lab_i_ref[...] == lab_j_ref[...]

    # Gram block on the MXU, f32 accumulation.
    g = lax.dot_general(
        e_i_ref[...], e_j_ref[...],
        dimension_numbers=(((1,), (1,)), ((), ())),
        preferred_element_type=jnp.float32,
    )                                                              # (t, t)

    dist = jnp.sqrt(jnp.maximum(sq_i_ref[...] + sq_j_ref[...] - 2.0 * g, 0.0))

    is_diag = i == j

    # Diagonal tile: first visit of this row block -> initialise the
    # accumulator. Only here do we need the strictly-upper-triangle mask, and
    # local tile indices suffice (the tile sits on the global diagonal).
    @pl.when(is_diag)
    def _diag():
        rows = lax.broadcasted_iota(jnp.int32, (t, t), 0)
        cols = lax.broadcasted_iota(jnp.int32, (t, t), 1)
        masked = jnp.where(jnp.logical_and(same, cols > rows), dist, 0.0)
        out_ref[...] = jnp.sum(masked, axis=0, keepdims=True).reshape(1, 1, t)

    # Off-diagonal tile: every entry is a valid upper-triangle pair, so the
    # label mask alone suffices (no iota / global-index arithmetic).
    @pl.when(jnp.logical_not(is_diag))
    def _off_diag():
        masked = jnp.where(same, dist, 0.0)
        out_ref[...] += jnp.sum(masked, axis=0, keepdims=True).reshape(1, 1, t)


def _fold_tables(num_t):
    """Balanced upper-triangle tile schedule.

    Row block p is paired with row block num_t-1-p (num_t must be even), so
    every fold has exactly num_t+1 tiles. Tiles of each row block form one
    contiguous run whose first tile is its diagonal tile.
    """
    assert num_t % 2 == 0 and num_t >= 2
    num_fold = num_t // 2
    steps_per_fold = num_t + 1
    i_tab = np.empty((num_fold, steps_per_fold), dtype=np.int32)
    j_tab = np.empty((num_fold, steps_per_fold), dtype=np.int32)
    for p in range(num_fold):
        r2 = num_t - 1 - p
        cols_hi = list(range(p, num_t))          # row block p      (num_t - p tiles)
        cols_lo = list(range(r2, num_t))         # row block r2     (p + 1 tiles)
        i_tab[p] = [p] * len(cols_hi) + [r2] * len(cols_lo)
        j_tab[p] = cols_hi + cols_lo
    return i_tab.reshape(-1), j_tab.reshape(-1), num_fold, steps_per_fold


def _vmem_limit_bytes(t, dim, itemsize):
    edge = 2 * 2 * t * dim * itemsize            # double-buffered e_i / e_j blocks
    strips = 2 * 2 * 2 * 4 * t + 2 * 4 * t       # label / sq-norm strips + out block
    epilogue = 10 * t * t * 4                    # live (t, t) f32 temporaries (generous)
    need = edge + strips + epilogue + (4 << 20)
    return int(min(max(need, 24 << 20), 56 << 20))


def orbit_collapse(embeddings, labels, *, block_size=None):
    """Pallas implementation of OrbitCollapse.forward with pairwise L2 distance."""
    n, dim = embeddings.shape
    if embeddings.dtype not in (jnp.float32, jnp.bfloat16):
        embeddings = embeddings.astype(jnp.float32)
    labels = labels.astype(jnp.int32)

    # Exact integer pair count (independent of embedding values); the division
    # happens outside the kernel.
    same = labels[:, None] == labels[None, :]
    count = (jnp.sum(same.astype(jnp.int32)) - n) // 2

    # Tile size: multiple of 128 (lane-dense strips, MXU-friendly). 256 keeps
    # the double-buffered (t, D) tiles + (t, t) epilogue temporaries well
    # inside v7x's 64 MiB VMEM for moderate D; drop to 128 for very large D.
    if block_size is None:
        block_size = 256 if dim <= 4096 else 128
        block_size = min(block_size, _round_up(n, 128))
    t = block_size

    # Pad rows so the number of row tiles is even (required by the folded
    # triangular schedule); padded rows carry unique sentinel labels so they
    # never form a pair and contribute nothing.
    n_pad = _round_up(n, t)
    if (n_pad // t) % 2 == 1:
        n_pad += t
    num_t = n_pad // t
    pad = n_pad - n
    if pad:
        embeddings = jnp.pad(embeddings, ((0, pad), (0, 0)))
        sentinel = jnp.min(labels) - 1 - jnp.arange(pad, dtype=jnp.int32)
        labels_p = jnp.concatenate([labels, sentinel])
    else:
        labels_p = labels

    # Precomputed squared norms (f32) as sublane-/lane-oriented strips.
    e_f32 = embeddings.astype(jnp.float32)
    sq = jnp.sum(e_f32 * e_f32, axis=1)
    sq_col = sq.reshape(n_pad, 1)            # row-block squared norms
    sq_row = sq.reshape(1, n_pad)            # column-block squared norms
    lab_col = labels_p.reshape(n_pad, 1)
    lab_row = labels_p.reshape(1, n_pad)

    # Balanced triangular schedule (scalar-prefetched block-index tables).
    i_tab_np, j_tab_np, num_fold, spf = _fold_tables(num_t)
    i_tab = jnp.asarray(i_tab_np)
    j_tab = jnp.asarray(j_tab_np)

    def row_blk(p, q, i_t, j_t):
        return (i_t[p * spf + q], 0)

    def col_blk(p, q, i_t, j_t):
        return (j_t[p * spf + q], 0)

    def col_strip(p, q, i_t, j_t):
        return (0, j_t[p * spf + q])

    def out_blk(p, q, i_t, j_t):
        return (i_t[p * spf + q], 0, 0)

    grid_spec = pltpu.PrefetchScalarGridSpec(
        num_scalar_prefetch=2,
        grid=(num_fold, spf),
        in_specs=[
            pl.BlockSpec((t, dim), row_blk),      # e_i  (row block)
            pl.BlockSpec((t, dim), col_blk),      # e_j  (column block)
            pl.BlockSpec((t, 1), row_blk),        # row-block labels
            pl.BlockSpec((1, t), col_strip),      # column-block labels
            pl.BlockSpec((t, 1), row_blk),        # row-block squared norms
            pl.BlockSpec((1, t), col_strip),      # column-block squared norms
        ],
        out_specs=pl.BlockSpec((1, 1, t), out_blk),
    )

    out = pl.pallas_call(
        _orbit_collapse_kernel,
        out_shape=jax.ShapeDtypeStruct((num_t, 1, t), jnp.float32),
        grid_spec=grid_spec,
        compiler_params=pltpu.CompilerParams(
            dimension_semantics=("parallel", "arbitrary"),
            vmem_limit_bytes=_vmem_limit_bytes(t, dim, embeddings.dtype.itemsize),
        ),
    )(i_tab, j_tab, embeddings, embeddings, lab_col, lab_row, sq_col, sq_row)

    total = jnp.sum(out)
    # NOTE: count == 0 (no label shared by two samples) yields inf/nan, matching
    # the reference PyTorch module's behaviour.
    return total / count.astype(jnp.float32)


def _reference_orbit_collapse(embeddings, labels):
    """Pure-JAX reference mirroring the PyTorch per-label upper-triangle loop."""
    e = embeddings.astype(jnp.float32)
    sq = jnp.sum(e * e, axis=1)
    d2 = jnp.maximum(sq[:, None] + sq[None, :] - 2.0 * (e @ e.T), 0.0)
    d = jnp.sqrt(d2)
    n = e.shape[0]
    row = jnp.arange(n)[:, None]
    col = jnp.arange(n)[None, :]
    mask = (labels[:, None] == labels[None, :]) & (col > row)
    return jnp.sum(jnp.where(mask, d, 0.0)) / jnp.sum(mask.astype(jnp.float32))


if __name__ == "__main__":
    key = jax.random.PRNGKey(0)
    k1, k2 = jax.random.split(key)

    # Case 1: small shape (N=32, D=128, 4 classes) -> exercises padding and
    # the even-num_t folded schedule with a mostly-padded second tile row.
    N, D, C = 32, 128, 4
    emb = jax.random.normal(k1, (N, D), dtype=jnp.float32)
    lab = jnp.arange(N, dtype=jnp.int32) % C
    loss = jax.block_until_ready(orbit_collapse(emb, lab))
    ref = jax.block_until_ready(_reference_orbit_collapse(emb, lab))
    assert jnp.allclose(loss, ref, rtol=1e-3, atol=1e-3), (loss, ref)

    # Case 2: non-multiple N exercising multi-tile folds, diagonal triangle
    # masking and off-diagonal label-only masking.
    N2, D2, C2 = 300, 128, 7
    emb2 = jax.random.normal(k2, (N2, D2), dtype=jnp.float32)
    lab2 = (jnp.arange(N2, dtype=jnp.int32) * 13) % C2
    loss2 = jax.block_until_ready(orbit_collapse(emb2, lab2))
    ref2 = jax.block_until_ready(_reference_orbit_collapse(emb2, lab2))
    assert jnp.allclose(loss2, ref2, rtol=1e-3, atol=1e-3), (loss2, ref2)

    print("KERNEL_OK")
</pallas_src>

<mosaic_0001>
module attributes {stable_mosaic.version = 11 : i64} {
  func.func @_orbit_collapse_kernel(%arg0: i32, %arg1: i32, %arg2: memref<3xi32, #tpu.memory_space<smem>>, %arg3: memref<3xi32, #tpu.memory_space<smem>>, %arg4: memref<128x128xf32, #tpu.memory_space<vmem>>, %arg5: memref<128x128xf32, #tpu.memory_space<vmem>>, %arg6: memref<128x1xi32, #tpu.memory_space<vmem>>, %arg7: memref<1x128xi32, #tpu.memory_space<vmem>>, %arg8: memref<128x1xf32, #tpu.memory_space<vmem>>, %arg9: memref<1x128xf32, #tpu.memory_space<vmem>>, %arg10: memref<1x1x128xf32, #tpu.memory_space<vmem>>) attributes {dimension_semantics = [#tpu.dimension_semantics<parallel>, #tpu.dimension_semantics<arbitrary>], iteration_bounds = array<i64: 1, 3>, scalar_prefetch = 2 : i64, scratch_operands = 0 : i64, tpu.core_type = #tpu.core_type<tc>, window_params = [{transform_indices = @transform_0, window_bounds = array<i64: 128, 128>}, {transform_indices = @transform_1, window_bounds = array<i64: 128, 128>}, {transform_indices = @transform_2, window_bounds = array<i64: 128, 1>}, {transform_indices = @transform_3, window_bounds = array<i64: 1, 128>}, {transform_indices = @transform_4, window_bounds = array<i64: 128, 1>}, {transform_indices = @transform_5, window_bounds = array<i64: 1, 128>}, {transform_indices = @transform_6, window_bounds = array<i64: 1, 1, 128>}]} {
    %c3_i32 = arith.constant 3 : i32
    %0 = arith.muli %arg0, %c3_i32 : i32
    %1 = arith.addi %0, %arg1 : i32
    %2 = arith.index_cast %1 : i32 to index
    %3 = memref.load %arg2[%2] : memref<3xi32, #tpu.memory_space<smem>>
    %4 = arith.index_cast %1 : i32 to index
    %5 = memref.load %arg3[%4] : memref<3xi32, #tpu.memory_space<smem>>
    %c0 = arith.constant 0 : index
    %c0_0 = arith.constant 0 : index
    %6 = vector.load %arg6[%c0, %c0_0] : memref<128x1xi32, #tpu.memory_space<vmem>>, vector<128x1xi32>
    %c0_1 = arith.constant 0 : index
    %c0_2 = arith.constant 0 : index
    %7 = vector.load %arg7[%c0_1, %c0_2] : memref<1x128xi32, #tpu.memory_space<vmem>>, vector<1x128xi32>
    %8 = vector.broadcast %6 : vector<128x1xi32> to vector<128x128xi32>
    %9 = vector.broadcast %7 : vector<1x128xi32> to vector<128x128xi32>
    %10 = arith.cmpi eq, %8, %9 : vector<128x128xi32>
    %c0_3 = arith.constant 0 : index
    %c0_4 = arith.constant 0 : index
    %11 = vector.load %arg4[%c0_3, %c0_4] : memref<128x128xf32, #tpu.memory_space<vmem>>, vector<128x128xf32>
    %c0_5 = arith.constant 0 : index
    %c0_6 = arith.constant 0 : index
    %12 = vector.load %arg5[%c0_5, %c0_6] : memref<128x128xf32, #tpu.memory_space<vmem>>, vector<128x128xf32>
    %cst = arith.constant dense<0.000000e+00> : vector<128x128xf32>
    %13 = tpu.matmul %11, %12, %cst {dimension_numbers = #tpu.dot_dimension_numbers<[1], [1], [0], [0], [0, 0, 1, 0], [], []>} : vector<128x128xf32>, vector<128x128xf32>, vector<128x128xf32> -> vector<128x128xf32>
    %c0_7 = arith.constant 0 : index
    %c0_8 = arith.constant 0 : index
    %14 = vector.load %arg8[%c0_7, %c0_8] : memref<128x1xf32, #tpu.memory_space<vmem>>, vector<128x1xf32>
    %c0_9 = arith.constant 0 : index
    %c0_10 = arith.constant 0 : index
    %15 = vector.load %arg9[%c0_9, %c0_10] : memref<1x128xf32, #tpu.memory_space<vmem>>, vector<1x128xf32>
    %16 = vector.broadcast %14 : vector<128x1xf32> to vector<128x128xf32>
    %17 = vector.broadcast %15 : vector<1x128xf32> to vector<128x128xf32>
    %18 = arith.addf %16, %17 : vector<128x128xf32>
    %cst_11 = arith.constant 2.000000e+00 : f32
    %19 = vector.broadcast %cst_11 : f32 to vector<128x128xf32>
    %20 = arith.mulf %19, %13 : vector<128x128xf32>
    %21 = arith.subf %18, %20 : vector<128x128xf32>
    %cst_12 = arith.constant 0.000000e+00 : f32
    %22 = vector.broadcast %cst_12 : f32 to vector<128x128xf32>
    %23 = arith.maximumf %21, %22 : vector<128x128xf32>
    %24 = math.sqrt %23 : vector<128x128xf32>
    %25 = arith.cmpi eq, %3, %5 : i32
    %26 = arith.extui %25 : i1 to i32
    %c0_i32 = arith.constant 0 : i32
    %27 = arith.cmpi ne, %26, %c0_i32 : i32
    scf.if %27 {
      %31 = tpu.iota {dimensions = array<i32: 0>} : vector<128x128xi32>
      %32 = tpu.iota {dimensions = array<i32: 1>} : vector<128x128xi32>
      %33 = arith.cmpi sgt, %32, %31 : vector<128x128xi32>
      %34 = arith.andi %10, %33 : vector<128x128xi1>
      %cst_14 = arith.constant 0.000000e+00 : f32
      %35 = vector.broadcast %cst_14 : f32 to vector<128x128xf32>
      %36 = arith.select %34, %24, %35 : vector<128x128xi1>, vector<128x128xf32>
      %cst_15 = arith.constant dense<0.000000e+00> : vector<128xf32>
      %37 = vector.multi_reduction <add>, %36, %cst_15 [0] : vector<128x128xf32> to vector<128xf32>
      %38 = vector.shape_cast %37 : vector<128xf32> to vector<1x128xf32>
      %39 = vector.shape_cast %38 : vector<1x128xf32> to vector<1x1x128xf32>
      %c0_16 = arith.constant 0 : index
      %c0_17 = arith.constant 0 : index
      %c0_18 = arith.constant 0 : index
      %40 = vector.load %arg10[%c0_16, %c0_17, %c0_18] : memref<1x1x128xf32, #tpu.memory_space<vmem>>, vector<1x1x128xf32>
      tpu.vector_store %arg10[%c0_16, %c0_17, %c0_18], %39 {strides = array<i32>} : memref<1x1x128xf32, #tpu.memory_space<vmem>>, vector<1x1x128xf32>,
    } else {
    }
    %true = arith.constant true
    %28 = arith.xori %25, %true : i1
    %29 = arith.extui %28 : i1 to i32
    %c0_i32_13 = arith.constant 0 : i32
    %30 = arith.cmpi ne, %29, %c0_i32_13 : i32
    scf.if %30 {
      %cst_14 = arith.constant 0.000000e+00 : f32
      %31 = vector.broadcast %cst_14 : f32 to vector<128x128xf32>
      %32 = arith.select %10, %24, %31 : vector<128x128xi1>, vector<128x128xf32>
      %c0_15 = arith.constant 0 : index
      %c0_16 = arith.constant 0 : index
      %c0_17 = arith.constant 0 : index
      %33 = vector.load %arg10[%c0_15, %c0_16, %c0_17] : memref<1x1x128xf32, #tpu.memory_space<vmem>>, vector<1x1x128xf32>
      %cst_18 = arith.constant dense<0.000000e+00> : vector<128xf32>
      %34 = vector.multi_reduction <add>, %32, %cst_18 [0] : vector<128x128xf32> to vector<128xf32>
      %35 = vector.shape_cast %34 : vector<128xf32> to vector<1x128xf32>
      %36 = vector.shape_cast %35 : vector<1x128xf32> to vector<1x1x128xf32>
      %37 = arith.addf %33, %36 : vector<1x1x128xf32>
      %c0_19 = arith.constant 0 : index
      %c0_20 = arith.constant 0 : index
      %c0_21 = arith.constant 0 : index
      %38 = vector.load %arg10[%c0_19, %c0_20, %c0_21] : memref<1x1x128xf32, #tpu.memory_space<vmem>>, vector<1x1x128xf32>
      tpu.vector_store %arg10[%c0_19, %c0_20, %c0_21], %37 {strides = array<i32>} : memref<1x1x128xf32, #tpu.memory_space<vmem>>, vector<1x1x128xf32>,
    } else {
    }
    return
  }
  func.func @transform_0(%arg0: i32, %arg1: i32, %arg2: memref<3xi32, #tpu.memory_space<smem>>, %arg3: memref<3xi32, #tpu.memory_space<smem>>) -> (i32, i32) {
    %c3_i32 = arith.constant 3 : i32
    %0 = arith.muli %arg0, %c3_i32 : i32
    %1 = arith.addi %0, %arg1 : i32
    %2 = arith.index_cast %1 : i32 to index
    %3 = memref.load %arg2[%2] : memref<3xi32, #tpu.memory_space<smem>>
    %c0_i32 = arith.constant 0 : i32
    %c0_i32_0 = arith.constant 0 : i32
    return %3, %c0_i32 : i32, i32
  }
  func.func @transform_1(%arg0: i32, %arg1: i32, %arg2: memref<3xi32, #tpu.memory_space<smem>>, %arg3: memref<3xi32, #tpu.memory_space<smem>>) -> (i32, i32) {
    %c3_i32 = arith.constant 3 : i32
    %0 = arith.muli %arg0, %c3_i32 : i32
    %1 = arith.addi %0, %arg1 : i32
    %2 = arith.index_cast %1 : i32 to index
    %3 = memref.load %arg3[%2] : memref<3xi32, #tpu.memory_space<smem>>
    %c0_i32 = arith.constant 0 : i32
    %c0_i32_0 = arith.constant 0 : i32
    return %3, %c0_i32 : i32, i32
  }
  func.func @transform_2(%arg0: i32, %arg1: i32, %arg2: memref<3xi32, #tpu.memory_space<smem>>, %arg3: memref<3xi32, #tpu.memory_space<smem>>) -> (i32, i32) {
    %c3_i32 = arith.constant 3 : i32
    %0 = arith.muli %arg0, %c3_i32 : i32
    %1 = arith.addi %0, %arg1 : i32
    %2 = arith.index_cast %1 : i32 to index
    %3 = memref.load %arg2[%2] : memref<3xi32, #tpu.memory_space<smem>>
    %c0_i32 = arith.constant 0 : i32
    %c0_i32_0 = arith.constant 0 : i32
    return %3, %c0_i32 : i32, i32
  }
  func.func @transform_3(%arg0: i32, %arg1: i32, %arg2: memref<3xi32, #tpu.memory_space<smem>>, %arg3: memref<3xi32, #tpu.memory_space<smem>>) -> (i32, i32) {
    %c3_i32 = arith.constant 3 : i32
    %0 = arith.muli %arg0, %c3_i32 : i32
    %1 = arith.addi %0, %arg1 : i32
    %2 = arith.index_cast %1 : i32 to index
    %3 = memref.load %arg3[%2] : memref<3xi32, #tpu.memory_space<smem>>
    %c0_i32 = arith.constant 0 : i32
    %c0_i32_0 = arith.constant 0 : i32
    return %c0_i32, %3 : i32, i32
  }
  func.func @transform_4(%arg0: i32, %arg1: i32, %arg2: memref<3xi32, #tpu.memory_space<smem>>, %arg3: memref<3xi32, #tpu.memory_space<smem>>) -> (i32, i32) {
    %c3_i32 = arith.constant 3 : i32
    %0 = arith.muli %arg0, %c3_i32 : i32
    %1 = arith.addi %0, %arg1 : i32
    %2 = arith.index_cast %1 : i32 to index
    %3 = memref.load %arg2[%2] : memref<3xi32, #tpu.memory_space<smem>>
    %c0_i32 = arith.constant 0 : i32
    %c0_i32_0 = arith.constant 0 : i32
    return %3, %c0_i32 : i32, i32
  }
  func.func @transform_5(%arg0: i32, %arg1: i32, %arg2: memref<3xi32, #tpu.memory_space<smem>>, %arg3: memref<3xi32, #tpu.memory_space<smem>>) -> (i32, i32) {
    %c3_i32 = arith.constant 3 : i32
    %0 = arith.muli %arg0, %c3_i32 : i32
    %1 = arith.addi %0, %arg1 : i32
    %2 = arith.index_cast %1 : i32 to index
    %3 = memref.load %arg3[%2] : memref<3xi32, #tpu.memory_space<smem>>
    %c0_i32 = arith.constant 0 : i32
    %c0_i32_0 = arith.constant 0 : i32
    return %c0_i32, %3 : i32, i32
  }
  func.func @transform_6(%arg0: i32, %arg1: i32, %arg2: memref<3xi32, #tpu.memory_space<smem>>, %arg3: memref<3xi32, #tpu.memory_space<smem>>) -> (i32, i32, i32) {
    %c3_i32 = arith.constant 3 : i32
    %0 = arith.muli %arg0, %c3_i32 : i32
    %1 = arith.addi %0, %arg1 : i32
    %2 = arith.index_cast %1 : i32 to index
    %3 = memref.load %arg2[%2] : memref<3xi32, #tpu.memory_space<smem>>
    %c0_i32 = arith.constant 0 : i32
    %c0_i32_0 = arith.constant 0 : i32
    %c0_i32_1 = arith.constant 0 : i32
    return %3, %c0_i32, %c0_i32_0 : i32, i32, i32
  }
}

</mosaic_0001>

<bundles_post_ra>
// kernel: tpu_custom_call.1
= control target key start
LH: loop header
LB: loop body
LE: loop exit
PB: predicated region body
PF: predicated region fallthrough
CT: control target
= control target key end

     0   :  { %s1584_s11 = smov [#allocation3]   ;;  %s1585_s12 = smov [#allocation4]   ;;  %s2358_s0 = inlined_call_operand.hbm [shape: s32[3], index: 0, kind: input, shape index: {}]   ;;  %s2359_s2 = inlined_call_operand.vmem [shape: f32[256,128], index: 2, kind: input, shape index: {}]   ;;  %s2360_s3 = inlined_call_operand.vmem [shape: f32[256,128], index: 3, kind: input, shape index: {}]   ;;  %s2361_s4 = inlined_call_operand.vmem [shape: s32[256,1], index: 4, kind: input, shape index: {}]   ;;  %s2362_s5 = inlined_call_operand.vmem [shape: s32[1,256], index: 5, kind: input, shape index: {}]   ;;  %s2363_s6 = inlined_call_operand.vmem [shape: f32[256,1], index: 6, kind: input, shape index: {}]   ;;  %s2364_s7 = inlined_call_operand.vmem [shape: f32[1,256], index: 7, kind: input, shape index: {}]   ;;  %s2365_s8 = inlined_call_operand.hbm [shape: f32[2,1,128], index: 8, kind: output, shape index: {}]   ;;  %s2366_s1 = inlined_call_operand.hbm [shape: s32[3], index: 1, kind: input, shape index: {}]  }
   0x1   :  { %s14_s29 = sshll.u32 %s2358_s0, 4  ;;  %s19_s10 = sshll.u32 %s2366_s1, 4  ;;  %s15_s29 = int_to_ptr.hbm [resolvable:$true] %s14_s29  ;;  %s20_s10 = int_to_ptr.hbm [resolvable:$true] %s19_s10 }
   0x2   :  { %17 = dma.hbm_to_smem %s15_s29, 16, %s1584_s11, [#allocation2] }
   0x3   :  { %22 = dma.hbm_to_smem %s20_s10, 16, %s1585_s12, [#allocation2] }
   0x4   :  { %1554 = dma.done.wait [#allocation2], 32 }
   0x5   :  { %1555 = vsyncadd [#allocation2], 4294967264 }
   0x6   :  { %25 = sfence }
   0x7   :  { %26 = vsyncpa [#allocation6], 0 }
   0x8   :  { %28 = vsyncpa [#allocation6 + $0x1], 0  ;;  %s1638_s13 = smov 0   ;;  %s1640_s14 = smov 0  }
   0x9   :  { %s1642_s0 = smov 0   ;;  %s1644_s15 = smov 0  }
   0xa   :  { %s1646_s1 = smov 0   ;;  %s1648_s16 = smov 0  }
   0xb LB: > { %s1316_s17 = sadd.s32 4294967295, %s1582_s16   ;;  %s1317_s18 = sadd.s32 4294967294, %s1582_s16   ;;  %s1582_s16 = sphi %s1648_s16, %s34_s16   ;;  %s1578_s1 = sphi %s1646_s1, %s2413_s1   ;;  %s1574_s15 = sphi %s1644_s15, %s2412_s15   ;;  %s1570_s0 = sphi %s1642_s0, %s2411_s0   ;;  %s1566_s14 = sphi %s1640_s14, %s2410_s14   ;;  %s1562_s13 = sphi %s1638_s13, %s2409_s13  }
   0xc   : > { %s43_s19 = sadd.s32 1, %s1578_s1  ;;  %s244_s20 = sld [smem:[#allocation3 + %s1578_s1]] }
   0xd   : > { %p44_p0 = scmp.ge.s32.totalorder %s43_s19, 3  ;;  %p261_p1 = scmp.ne.s32.totalorder %s1570_s0, %s1566_s14 }
   0xe   : > { %p262_p2 = scmp.eq.s32.totalorder %s1316_s17, 2  ;;  %p267_p4 = scmp.ne.s32.totalorder %s1566_s14, %s1562_s13 }
   0xf   : > { %s2415_s19 = smov (%p44_p0, %s43_s19), 0  ;;  %p268_p5 = scmp.eq.s32.totalorder %s1317_s18, 2 }
  0x10   : > { %p1676_p3 = por %p262_p2, %p261_p1  ;;  %s247_s22 = sld [smem:[#allocation3 + %s2415_s19]] }
  0x11   : > { %p1320_p6 = scmp.ge.s32.totalorder %s1582_s16, 1  ;;  %p370_p7 = scmp.lt.s32.totalorder %s1582_s16, 4 }
  0x12   : > { %p1685_p8 = por %p268_p5, %p267_p4  ;;  %s251_s25 = sadd.s32 1, %s1570_s0 }
  0x13   : > { %p371_p9 = pnand %p1320_p6, %p370_p7 }
  0x14   : > { %s464_s27 = sld [smem:[#allocation3 + %s1574_s15]] (!%p371_p9) }
  0x15   : > { %374 = sbr.rel (%p371_p9) target bundleno = 427 (0x1ab), region = 44  ;;  %s452_s29 = sld [smem:[#allocation4 + %s1574_s15]] (!%p371_p9) }
  0x16   : > { %s248_s24 = ssub.s32 %s244_s20, %s247_s22  ;;  %s1697_s30 = sld [smem:[#allocation3 + %s1574_s15]] (!%p371_p9) }
  0x17   : > { %p249_p10 = scmp.eq.s32.totalorder %s248_s24, 0  ;;  %s1700_s9 = sld [smem:[#allocation4 + %s1574_s15]] (!%p371_p9) }
  0x18   : > { %s476_s12 = sld [smem:[#allocation4 + %s1574_s15]] (!%p371_p9) }
  0x19   : > { %s1691_s26 = scalar_select %p249_p10, %s1570_s0, %s251_s25  }
  0x1a   : > { %v1586_v0 = vmov 0   ;;  %s1325_s10 = sshll.u32 %s464_s27, 4  ;;  %s1733_s20 = sld [smem:[#allocation3 + %s1574_s15]] }
  0x1b   : > { %1443 = vset.pattern.permute.xlu2 %v1586_v0  ;;  %1442 = vset.pattern.permute.xlu1 %v1586_v0  ;;  %p466_p11 = scmp.lt.s32.totalorder %s1325_s10, 31  ;;  %s1323_s11 = sshll.u32 %s452_s29, 4 }
  0x1c   : > { %1441 = vset.pattern.permute.xlu0 %v1586_v0  ;;  %p454_p12 = scmp.lt.s32.totalorder %s1323_s11, 31  ;;  %s1761_s28 = sld [smem:[#allocation3 + %s1574_s15]] }
  0x1d   : > { %s2417_s10 = smov (!%p466_p11, %s1325_s10), 31  ;;  %p1329_p4 = scmp.ne.s32.totalorder %s1697_s30, %s1700_s9 }
  0x1e   : > { %s2419_s11 = smov (!%p454_p12, %s1323_s11), 31  ;;  %s1326_s17 = sshll.u32 %s2417_s10, 3 }
  0x1f   : > { %s1706_s22 = scalar_lea.vmem %s2361_s4, %s1326_s17  ;;  %s1324_s24 = sshll.u32 %s2419_s11, 3 }
  0x20   : > { %v515_v1 = vld [vmem:[%s1706_s22 + $0x20] sm:$0xff]  ;;  %v513_v2 = vld [vmem:[%s1706_s22 + $0x10] sm:$0xff]  ;;  %s1714_s29 = scalar_lea.vmem %s2360_s3, %s1324_s24  ;;  %p477_p13 = scmp.lt.s32.totalorder %s476_s12, 1  ;;  %v516_v6 = vld [vmem:[%s1706_s22 + $0x28] sm:$0xff] }
  0x21   : > { %v511_v3 = vld [vmem:[%s1706_s22] sm:$0xff]  ;;  %541 = vperm.xlu2 %1443, %v515_v1   ;;  %535 = vperm.xlu1 %1442, %v513_v2   ;;  %v624_v4 = vld [vmem:[%s1714_s29 + $0x78] sm:$0xff]  ;;  %v623_v5 = vld [vmem:[%s1714_s29 + $0x70] sm:$0xff]  ;;  %s497_s10 = sld [smem:[#allocation4 + %s1574_s15]]  ;;  %s1327_s11 = sshll.u32 %s1733_s20, 4 }
  0x22   : > { %529 = vperm.xlu0 %1441, %v511_v3   ;;  %625 = vmatpush.xpose.msra.mxu0 %v624_v4  ;;  %v514_v7 = vld [vmem:[%s1706_s22 + $0x18] sm:$0xff]  ;;  %v512_v8 = vld [vmem:[%s1706_s22 + $0x8] sm:$0xff]  ;;  %s2421_s12 = smov (!%p477_p13, %s476_s12), 1  ;;  %v621_v10 = vld [vmem:[%s1714_s29 + $0x60] sm:$0xff]  ;;  %p487_p1 = scmp.lt.s32.totalorder %s1327_s11, 31 }
  0x23   : > { %1333 = vmatpush.xpose.msra.mxu1 %v624_v4  ;;  %1334 = vmatpush.xpose.msra.mxu2 %v624_v4  ;;  %v622_v9 = vld [vmem:[%s1714_s29 + $0x68] sm:$0xff]  ;;  %s479_s18 = scalar_lea.vmem %s2362_s5, %s2421_s12  ;;  %v519_v11 = vld [vmem:[%s1706_s22 + $0x40] sm:$0xff]  ;;  %v518_v12 = vld [vmem:[%s1706_s22 + $0x38] sm:$0xff] }
  0x24   : > { %1335 = vmatpush.xpose.msra.mxu3 %v624_v4  ;;  %v517_v13 = vld [vmem:[%s1706_s22 + $0x30] sm:$0xff]  ;;  %v620_v14 = vld [vmem:[%s1714_s29 + $0x58] sm:$0xff]  ;;  %v520_v18 = vld [vmem:[%s1706_s22 + $0x48] sm:$0xff]  ;;  %s2425_s11 = smov (!%p487_p1, %s1327_s11), 31 }
  0x25   : > { %v619_v15 = vld [vmem:[%s1714_s29 + $0x50] sm:$0xff]  ;;  %v522_v16 = vld [vmem:[%s1706_s22 + $0x58] sm:$0xff]  ;;  %v618_v19 = vld [vmem:[%s1714_s29 + $0x48] sm:$0xff]  ;;  %s1328_s17 = sshll.u32 %s2425_s11, 3  ;;  %s1321_s11 = sshll.u32 %s1761_s28, 4 }
  0x26   : > { %626 = vmatpush.xpose.msra.mxu0 %v623_v5  ;;  %v521_v17 = vld [vmem:[%s1706_s22 + $0x50] sm:$0xff]  ;;  %v617_v20 = vld [vmem:[%s1714_s29 + $0x40] sm:$0xff]  ;;  %v524_v22 = vld [vmem:[%s1706_s22 + $0x68] sm:$0xff]  ;;  %s1758_s25 = scalar_lea.vmem %s2363_s6, %s1328_s17  ;;  %p442_p2 = scmp.lt.s32.totalorder %s1321_s11, 31 }
  0x27   : > { %1336 = vmatpush.xpose.msra.mxu1 %v623_v5  ;;  %1337 = vmatpush.xpose.msra.mxu2 %v623_v5  ;;  %p498_p0 = scmp.lt.s32.totalorder %s497_s10, 1  ;;  %v525_v21 = vld [vmem:[%s1706_s22 + $0x70] sm:$0xff]  ;;  %v523_v23 = vld [vmem:[%s1706_s22 + $0x60] sm:$0xff]  ;;  %v616_v24 = vld [vmem:[%s1714_s29 + $0x38] sm:$0xff] }
  0x28   : > { %1338 = vmatpush.xpose.msra.mxu3 %v623_v5  ;;  %v615_v25 = vld [vmem:[%s1714_s29 + $0x30] sm:$0xff]  ;;  %v691_v26 = vld [vmem:[%s1758_s25 + $0x8] sm:$0xff]  ;;  %v690_v27 = vld [vmem:[%s1758_s25] sm:$0xff]  ;;  %s2427_s11 = smov (!%p442_p2, %s1321_s11), 31 }
  0x29   : > { %544 = vperm.xlu2 %1443, %v516_v6   ;;  %538 = vperm.xlu1 %1442, %v514_v7   ;;  %s2423_s10 = smov (!%p498_p0, %s497_s10), 1  ;;  %v526_v28 = vld [vmem:[%s1706_s22 + $0x78] sm:$0xff]  ;;  %v614_v29 = vld [vmem:[%s1714_s29 + $0x28] sm:$0xff]  ;;  %v613_v30 = vld [vmem:[%s1714_s29 + $0x20] sm:$0xff]  ;;  %s1322_s28 = sshll.u32 %s2427_s11, 3 }
  0x2a   : > { %532 = vperm.xlu0 %1441, %v512_v8   ;;  %627 = vmatpush.xpose.msra.mxu0 %v622_v9  ;;  %s500_s27 = scalar_lea.vmem %s2364_s7, %s2423_s10  ;;  %v694_v31 = vld [vmem:[%s1758_s25 + $0x20] sm:$0xff]  ;;  %v693_v32 = vld [vmem:[%s1758_s25 + $0x18] sm:$0xff]  ;;  %v692_v33 = vld [vmem:[%s1758_s25 + $0x10] sm:$0xff]  ;;  %s1782_s20 = scalar_lea.vmem %s2359_s2, %s1322_s28 }
  0x2b   : > { %1339 = vmatpush.xpose.msra.mxu1 %v622_v9  ;;  %1340 = vmatpush.xpose.msra.mxu2 %v622_v9  ;;  %v612_v34 = vld [vmem:[%s1714_s29 + $0x18] sm:$0xff]  ;;  %v611_v35 = vld [vmem:[%s1714_s29 + $0x10] sm:$0xff]  ;;  %v695_v38 = vld [vmem:[%s1758_s25 + $0x28] sm:$0xff]  ;;  %s2371_s10 = sand.u32 1, %s1566_s14  }
  0x2c   : > { %1341 = vmatpush.xpose.msra.mxu3 %v622_v9  ;;  %v697_v36 = vld [vmem:[%s1758_s25 + $0x38] sm:$0xff]  ;;  %v696_v37 = vld [vmem:[%s1758_s25 + $0x30] sm:$0xff]  ;;  %v610_v39 = vld [vmem:[%s1714_s29 + $0x8] sm:$0xff] }
  0x2d   : > { %v609_v40 = vld [vmem:[%s1714_s29] sm:$0xff]  ;;  %v700_v42 = vld [vmem:[%s1758_s25 + $0x50] sm:$0xff]  ;;  %v699_v46 = vld [vmem:[%s1758_s25 + $0x48] sm:$0xff] }
  0x2e   : > { %628 = vmatpush.xpose.msra.mxu0 %v621_v10  ;;  %v593_v41 = vld [vmem:[%s1782_s20] sm:$0xff]  ;;  %v594_v48 = vld [vmem:[%s1782_s20 + $0x8] sm:$0xff]  ;;  %v701_v54 = vld [vmem:[%s1758_s25 + $0x58] sm:$0xff] }
  0x2f   : > { %1342 = vmatpush.xpose.msra.mxu1 %v621_v10  ;;  %1343 = vmatpush.xpose.msra.mxu2 %v621_v10  ;;  %v597_v43 = vld [vmem:[%s1782_s20 + $0x20] sm:$0xff]  ;;  %v703_v49 = vld [vmem:[%s1758_s25 + $0x68] sm:$0xff]  ;;  %v595_v55 = vld [vmem:[%s1782_s20 + $0x10] sm:$0xff] }
  0x30   : > { %1344 = vmatpush.xpose.msra.mxu3 %v621_v10  ;;  %v601_v44 = vld [vmem:[%s1782_s20 + $0x40] sm:$0xff]  ;;  %v598_v50 = vld [vmem:[%s1782_s20 + $0x28] sm:$0xff]  ;;  %v599_v56 = vld [vmem:[%s1782_s20 + $0x30] sm:$0xff] }
  0x31   : > { %553 = vperm.xlu2 %1443, %v519_v11   ;;  %550 = vperm.xlu1 %1442, %v518_v12   ;;  %v605_v45 = vld [vmem:[%s1782_s20 + $0x60] sm:$0xff]  ;;  %v602_v51 = vld [vmem:[%s1782_s20 + $0x48] sm:$0xff]  ;;  %v603_v57 = vld [vmem:[%s1782_s20 + $0x50] sm:$0xff] }
  0x32   : > { %547 = vperm.xlu0 %1441, %v517_v13   ;;  %629 = vmatpush.xpose.msra.mxu0 %v620_v14  ;;  %v698_v47 = vld [vmem:[%s1758_s25 + $0x40] sm:$0xff]  ;;  %v606_v52 = vld [vmem:[%s1782_s20 + $0x68] sm:$0xff]  ;;  %v607_v58 = vld [vmem:[%s1782_s20 + $0x70] sm:$0xff] }
  0x33   : > { %1345 = vmatpush.xpose.msra.mxu1 %v620_v14  ;;  %1346 = vmatpush.xpose.msra.mxu2 %v620_v14  ;;  %v702_v53 = vld [vmem:[%s1758_s25 + $0x60] sm:$0xff]  ;;  %v705_v59 = vld [vmem:[%s1758_s25 + $0x78] sm:$0xff]  ;;  %v704_v60 = vld [vmem:[%s1758_s25 + $0x70] sm:$0xff] }
  0x34   : > { %1347 = vmatpush.xpose.msra.mxu3 %v620_v14  ;;  %v596_v61 = vld [vmem:[%s1782_s20 + $0x18] sm:$0xff]  ;;  %v1813_v1 = vld [vmem:[%s479_s18] ss:$0 sm:$0xff] }
  0x35   : > { %v600_v62 = vld [vmem:[%s1782_s20 + $0x38] sm:$0xff] }
  0x36   : > { %630 = vmatpush.xpose.msra.mxu0 %v619_v15  ;;  %v604_v63 = vld [vmem:[%s1782_s20 + $0x58] sm:$0xff] }
  0x37   : > { %1348 = vmatpush.xpose.msra.mxu1 %v619_v15  ;;  %1349 = vmatpush.xpose.msra.mxu2 %v619_v15  ;;  %v608_v0 = vld [vmem:[%s1782_s20 + $0x78] sm:$0xff] }
  0x38   : > { %1350 = vmatpush.xpose.msra.mxu3 %v619_v15 }
  0x39   : > { %562 = vperm.xlu2 %1443, %v522_v16   ;;  %559 = vperm.xlu1 %1442, %v521_v17  }
  0x3a   : > { %556 = vperm.xlu0 %1441, %v520_v18   ;;  %631 = vmatpush.xpose.msra.mxu0 %v618_v19 }
  0x3b   : > { %1351 = vmatpush.xpose.msra.mxu1 %v618_v19  ;;  %1352 = vmatpush.xpose.msra.mxu2 %v618_v19 }
  0x3c   : > { %1353 = vmatpush.xpose.msra.mxu3 %v618_v19 }
  0x3e   : > { %632 = vmatpush.xpose.msra.mxu0 %v617_v20 }
  0x3f   : > { %1354 = vmatpush.xpose.msra.mxu1 %v617_v20  ;;  %1355 = vmatpush.xpose.msra.mxu2 %v617_v20 }
  0x40   : > { %1356 = vmatpush.xpose.msra.mxu3 %v617_v20 }
  0x41   : > { %571 = vperm.xlu2 %1443, %v525_v21   ;;  %568 = vperm.xlu1 %1442, %v524_v22  }
  0x42   : > { %565 = vperm.xlu0 %1441, %v523_v23   ;;  %633 = vmatpush.xpose.msra.mxu0 %v616_v24 }
  0x43   : > { %1357 = vmatpush.xpose.msra.mxu1 %v616_v24  ;;  %1358 = vmatpush.xpose.msra.mxu2 %v616_v24 }
  0x44   : > { %1359 = vmatpush.xpose.msra.mxu3 %v616_v24 }
  0x46   : > { %634 = vmatpush.xpose.msra.mxu0 %v615_v25 }
  0x47   : > { %1360 = vmatpush.xpose.msra.mxu1 %v615_v25  ;;  %1361 = vmatpush.xpose.msra.mxu2 %v615_v25 }
  0x48   : > { %1362 = vmatpush.xpose.msra.mxu3 %v615_v25 }
  0x49   : > { %714 = vperm.xlu2 %1443, %v691_v26   ;;  %709 = vperm.xlu1 %1442, %v690_v27   ;;  %v1884_v27 = vld [vmem:[%s500_s27] ss:$0 sm:$0xff]  ;;  %s2112_s27 = scalar_lea.vmem [#allocation5], %s2371_s10 }
  0x4a   : > { %574 = vperm.xlu0 %1441, %v526_v28   ;;  %635 = vmatpush.xpose.msra.mxu0 %v614_v29 }
  0x4b   : > { %1363 = vmatpush.xpose.msra.mxu1 %v614_v29  ;;  %1364 = vmatpush.xpose.msra.mxu2 %v614_v29 }
  0x4c   : > { %1365 = vmatpush.xpose.msra.mxu3 %v614_v29 }
  0x4e   : > { %636 = vmatpush.xpose.msra.mxu0 %v613_v30 }
  0x4f   : > { %1366 = vmatpush.xpose.msra.mxu1 %v613_v30  ;;  %1367 = vmatpush.xpose.msra.mxu2 %v613_v30 }
  0x50   : > { %1368 = vmatpush.xpose.msra.mxu3 %v613_v30 }
  0x51   : > { %729 = vperm.xlu2 %1443, %v694_v31   ;;  %724 = vperm.xlu1 %1442, %v693_v32  }
  0x52   : > { %719 = vperm.xlu0 %1441, %v692_v33   ;;  %637 = vmatpush.xpose.msra.mxu0 %v612_v34 }
  0x53   : > { %1369 = vmatpush.xpose.msra.mxu1 %v612_v34  ;;  %1370 = vmatpush.xpose.msra.mxu2 %v612_v34 }
  0x54   : > { %1371 = vmatpush.xpose.msra.mxu3 %v612_v34 }
  0x56   : > { %638 = vmatpush.xpose.msra.mxu0 %v611_v35 }
  0x57   : > { %1372 = vmatpush.xpose.msra.mxu1 %v611_v35  ;;  %1373 = vmatpush.xpose.msra.mxu2 %v611_v35 }
  0x58   : > { %1374 = vmatpush.xpose.msra.mxu3 %v611_v35 }
  0x59   : > { %744 = vperm.xlu2 %1443, %v697_v36   ;;  %739 = vperm.xlu1 %1442, %v696_v37  }
  0x5a   : > { %734 = vperm.xlu0 %1441, %v695_v38   ;;  %639 = vmatpush.xpose.msra.mxu0 %v610_v39 }
  0x5b   : > { %1375 = vmatpush.xpose.msra.mxu1 %v610_v39  ;;  %1376 = vmatpush.xpose.msra.mxu2 %v610_v39 }
  0x5c   : > { %1377 = vmatpush.xpose.msra.mxu3 %v610_v39 }
  0x5e   : > { %640 = vmatpush.xpose.msra.mxu0 %v609_v40 }
  0x5f   : > { %1378 = vmatpush.xpose.msra.mxu1 %v609_v40  ;;  %1379 = vmatpush.xpose.msra.mxu2 %v609_v40 }
  0x60   : > { %1380 = vmatpush.xpose.msra.mxu3 %v609_v40 }
  0x61   : > { %641 = vmatmul.f32.vlgmr.msra.gmra.mxu0 %v593_v41  ;;  %759 = vperm.xlu2 %1443, %v700_v42  }
  0x62   : > { %653 = vmatmul.f32.vlgmr.msra.gmra.mxu1 %v597_v43  ;;  %665 = vmatmul.f32.vlgmr.msra.gmra.mxu2 %v601_v44 }
  0x63   : > { %677 = vmatmul.f32.vlgmr.msra.gmra.mxu3 %v605_v45  ;;  %754 = vperm.xlu1 %1442, %v699_v46  }
  0x64   : > { %749 = vperm.xlu0 %1441, %v698_v47  }
  0x69   : > { %644 = vmatmul.f32.gmra.mxu0 %v594_v48  ;;  %774 = vperm.xlu2 %1443, %v703_v49  }
  0x6a   : > { %656 = vmatmul.f32.gmra.mxu1 %v598_v50  ;;  %668 = vmatmul.f32.gmra.mxu2 %v602_v51 }
  0x6b   : > { %680 = vmatmul.f32.gmra.mxu3 %v606_v52  ;;  %769 = vperm.xlu1 %1442, %v702_v53  }
  0x6c   : > { %764 = vperm.xlu0 %1441, %v701_v54  }
  0x71   : > { %647 = vmatmul.f32.gmra.mxu0 %v595_v55 }
  0x72   : > { %659 = vmatmul.f32.gmra.mxu1 %v599_v56  ;;  %671 = vmatmul.f32.gmra.mxu2 %v603_v57 }
  0x73   : > { %683 = vmatmul.f32.gmra.mxu3 %v607_v58  ;;  %784 = vperm.xlu1 %1442, %v705_v59  }
  0x74   : > { %779 = vperm.xlu0 %1441, %v704_v60  }
  0x79   : > { %650 = vmatmul.f32.gmra.mxu0 %v596_v61 }
  0x7a   : > { %662 = vmatmul.f32.gmra.mxu1 %v600_v62  ;;  %674 = vmatmul.f32.gmra.mxu2 %v604_v63 }
  0x7b   : > { %686 = vmatmul.f32.gmra.mxu3 %v608_v0  ;;  %v1815_v2 = vpop.permute.xlu2 %541 }
  0x7c   : > { %vm581_vm0 = vcmp.eq.s32.totalorder %v1815_v2, %v1813_v1 }
  0x83   : > { %v1819_v3 = vpop.permute.xlu2 %544 }
  0x84   : > { %vm2368_vm1 = vcmp.eq.s32.totalorder %v1819_v3, %v1813_v1 }
  0x8b   : > { %v1823_v4 = vpop.permute.xlu2 %553 }
  0x93   : > { %v1827_v5 = vpop.permute.xlu2 %562  ;;  %v1829_v6 = vpop.permute.xlu1 %535 }
  0x94   : > { %vm579_vm4 = vcmp.eq.s32.totalorder %v1829_v6, %v1813_v1  ;;  %v1835_v7 = vpop.permute.xlu0 %529 }
  0x95   : > { %vm577_vm5 = vcmp.eq.s32.totalorder %v1835_v7, %v1813_v1 }
  0x9b   : > { %v1839_v8 = vpop.permute.xlu2 %571  ;;  %v1841_v9 = vpop.permute.xlu1 %538 }
  0x9c   : > { %vm580_vm7 = vcmp.eq.s32.totalorder %v1841_v9, %v1813_v1  ;;  %v1847_v10 = vpop.permute.xlu0 %532 }
  0x9d   : > { %vm578_vm8 = vcmp.eq.s32.totalorder %v1847_v10, %v1813_v1 }
  0xa3   : > { %v1851_v11 = vpop.permute.xlu1 %550  ;;  %v715_v19 = vpop.permute.xlu2 %714 }
  0xa4   : > { %v1855_v12 = vpop.permute.xlu0 %547  ;;  %v791_v49 = vadd.f32 %v1884_v27, %v715_v19 }
  0xa5   : > { %vm2367_vm10 = vcmp.eq.s32.totalorder %v1855_v12, %v1813_v1 }
  0xab   : > { %v1859_v13 = vpop.permute.xlu1 %559  ;;  %v730_v21 = vpop.permute.xlu2 %729 }
  0xac   : > { %v1863_v14 = vpop.permute.xlu0 %556  ;;  %v794_v32 = vadd.f32 %v1884_v27, %v730_v21 }
  0xb3   : > { %v1867_v15 = vpop.permute.xlu1 %568  ;;  %v745_v24 = vpop.permute.xlu2 %744 }
  0xb4   : > { %v1871_v16 = vpop.permute.xlu0 %565  ;;  %v1903_v62 = vadd.f32 %v1884_v27, %v745_v24 }
  0xbb   : > { %v710_v17 = vpop.permute.xlu1 %709  ;;  %v760_v34 = vpop.permute.xlu2 %759 }
  0xbc   : > { %v1875_v18 = vpop.permute.xlu0 %574  ;;  %v790_v29 = vadd.f32 %v1884_v27, %v710_v17  ;;  %v1909_v17 = vadd.f32 %v1884_v27, %v760_v34 }
  0xc3   : > { %v725_v20 = vpop.permute.xlu1 %724  ;;  %v775_v58 = vpop.permute.xlu2 %774 }
  0xc4   : > { %v720_v22 = vpop.permute.xlu0 %719 }
  0xcb   : > { %v740_v23 = vpop.permute.xlu1 %739 }
  0xcc   : > { %v735_v25 = vpop.permute.xlu0 %734 }
  0xcd   : > { %v795_v50 = vadd.f32 %v1884_v27, %v735_v25 }
  0xd5   : > { %v755_v26 = vpop.permute.xlu1 %754 }
  0xd6   : > { %v750_v37 = vpop.permute.xlu0 %749 }
  0xd7   : > { %v798_v43 = vadd.f32 %v1884_v27, %v750_v37 }
  0xdd   : > { %v770_v39 = vpop.permute.xlu1 %769 }
  0xde   : > { %v642_v28 = vpop.f32.mrf.mxu0  ;;  %v802_v44 = vadd.f32 %v1884_v27, %v770_v39  ;;  %v765_v19 = vpop.permute.xlu0 %764 }
  0xdf   : > { %v806_v30 = vmul.f32 2.0, %v642_v28  ;;  %v654_v31 = vpop.f32.mrf.mxu1  ;;  %v803_v28 = vadd.f32 %v1884_v27, %v775_v58 }
  0xe0   : > { %v810_v33 = vmul.f32 2.0, %v654_v31  ;;  %v1922_v31 = vadd.f32 %v1884_v27, %v740_v23 }
  0xe1   : > { %v822_v35 = vsub.f32 %v790_v29, %v806_v30  ;;  %v1917_v29 = vadd.f32 %v1884_v27, %v725_v20  ;;  %v792_v30 = vadd.f32 %v1884_v27, %v720_v22 }
  0xe2   : > { %v826_v36 = vsub.f32 %v794_v32, %v810_v33 }
  0xe3   : > { %v1888_v38 = vmax.f32 %v822_v35, 0.0  ;;  %v799_v35 = vadd.f32 %v1884_v27, %v755_v26 }
  0xe4   : > { %v1890_v40 = vmax.f32 %v826_v36, 0.0  ;;  %v1927_v36 = vadd.f32 %v1884_v27, %v765_v19 }
  0xe5   : > { %1446 = vrsqrt.f32 %v1888_v38  ;;  %v666_v41 = vpop.f32.mrf.mxu2  ;;  %vm861_vm15 = vcmp.eq.f32.partialorder %v1888_v38, inf  ;;  %vm863_vm6 = vcmp.eq.f32.partialorder %v1888_v38, 0.0  ;;  %v864_v22 = vand.u32 2147483648, %v1888_v38 }
  0xe6   : > { %1448 = vrsqrt.f32 %v1890_v40  ;;  %v678_v42 = vpop.f32.mrf.mxu3  ;;  %v814_v45 = vmul.f32 2.0, %v666_v41  ;;  %v645_v47 = vpop.f32.mrf.mxu0  ;;  %vm909_vm13 = vcmp.eq.f32.partialorder %v1890_v40, inf  ;;  %vm911_vm14 = vcmp.eq.f32.partialorder %v1890_v40, 0.0 }
  0xe7   : > { %v818_v46 = vmul.f32 2.0, %v678_v42  ;;  %v657_v48 = vpop.f32.mrf.mxu1  ;;  %v807_v51 = vmul.f32 2.0, %v645_v47 }
  0xe8   : > { %v811_v52 = vmul.f32 2.0, %v657_v48  ;;  %v830_v53 = vsub.f32 %v798_v43, %v814_v45  ;;  %v912_v45 = vand.u32 2147483648, %v1890_v40 }
  0xe9   : > { %v834_v54 = vsub.f32 %v802_v44, %v818_v46  ;;  %v823_v55 = vsub.f32 %v791_v49, %v807_v51 }
  0xea   : > { %v827_v56 = vsub.f32 %v795_v50, %v811_v52  ;;  %v1898_v59 = vmax.f32 %v830_v53, 0.0 }
  0xeb   : > { %v1447_v57 = vpop.eup %1446  ;;  %v1900_v60 = vmax.f32 %v834_v54, 0.0  ;;  %v1906_v0 = vmax.f32 %v823_v55, 0.0 }
  0xec   : > { %v1449_v61 = vpop.eup %1448  ;;  %v855_v63 = vmul.f32 %v1447_v57, %v1888_v38  ;;  %1450 = vrsqrt.f32 %v1898_v59  ;;  %v1913_v25 = vmax.f32 %v827_v56, 0.0  ;;  %vm957_vm3 = vcmp.eq.f32.partialorder %v1898_v59, inf }
  0xed   : > { %v903_v21 = vmul.f32 %v1449_v61, %v1890_v40  ;;  %1452 = vrsqrt.f32 %v1900_v60  ;;  %v669_v33 = vpop.f32.mrf.mxu2  ;;  %vm959_vm11 = vcmp.eq.f32.partialorder %v1898_v59, 0.0 }
  0xee   : > { %v856_v24 = vmul.f32 %v1447_v57, %v855_v63  ;;  %1454 = vrsqrt.f32 %v1906_v0  ;;  %v681_v34 = vpop.f32.mrf.mxu3  ;;  %v648_v37 = vpop.f32.mrf.mxu0  ;;  %v815_v41 = vmul.f32 2.0, %v669_v33  ;;  %vm921_vm12 = vcmp.eq.f32.partialorder %v1913_v25, inf }
  0xef   : > { %v904_v32 = vmul.f32 %v1449_v61, %v903_v21  ;;  %1456 = vrsqrt.f32 %v1913_v25  ;;  %v819_v42 = vmul.f32 2.0, %v681_v34  ;;  %v660_v26 = vpop.f32.mrf.mxu1  ;;  %v808_v46 = vmul.f32 2.0, %v648_v37 }
  0xf0   : > { %v857_v20 = vmul.f32 0.5, %v856_v24  ;;  %v831_v50 = vsub.f32 %v799_v35, %v815_v41  ;;  %v812_v56 = vmul.f32 2.0, %v660_v26 }
  0xf1   : > { %v905_v23 = vmul.f32 0.5, %v904_v32  ;;  %v835_v51 = vsub.f32 %v803_v28, %v819_v42  ;;  %v824_v55 = vsub.f32 %v792_v30, %v808_v46 }
  0xf2   : > { %v858_v39 = vsub.f32 1.5, %v857_v20  ;;  %v1451_v43 = vpop.eup %1450  ;;  %v1940_v21 = vmax.f32 %v831_v50, 0.0 }
  0xf3   : > { %v906_v44 = vsub.f32 1.5, %v905_v23  ;;  %v1453_v47 = vpop.eup %1452  ;;  %v951_v49 = vmul.f32 %v1451_v43, %v1898_v59  ;;  %v1944_v28 = vmax.f32 %v835_v51, 0.0 }
  0xf4   : > { %v859_v48 = vmul.f32 %v1447_v57, %v858_v39  ;;  %v1455_v52 = vpop.eup %1454  ;;  %v999_v54 = vmul.f32 %v1453_v47, %v1900_v60  ;;  %1458 = vrsqrt.f32 %v1940_v21 }
  0xf5   : > { %v907_v53 = vmul.f32 %v1449_v61, %v906_v44  ;;  %v952_v63 = vmul.f32 %v1451_v43, %v951_v49  ;;  %v867_v19 = vmul.f32 %v1455_v52, %v1906_v0  ;;  %v1457_v24 = vpop.eup %1456  ;;  %v1946_v61 = vmax.f32 %v824_v55, 0.0  ;;  %v672_v50 = vpop.f32.mrf.mxu2 }
  0xf6   : > { %v860_v58 = vmul.f32 %v859_v48, %v1888_v38  ;;  %v1000_v32 = vmul.f32 %v1453_v47, %v999_v54  ;;  %v915_v35 = vmul.f32 %v1457_v24, %v1913_v25  ;;  %v960_v44 = vand.u32 2147483648, %v1898_v59 }
  0xf7   : > { %v908_v57 = vmul.f32 %v907_v53, %v1890_v40  ;;  %v953_v33 = vmul.f32 0.5, %v952_v63  ;;  %v868_v34 = vmul.f32 %v1455_v52, %v867_v19  ;;  %1460 = vrsqrt.f32 %v1944_v28  ;;  %v780_v63 = vpop.permute.xlu0 %779 }
  0xf8   : > { %v862_v30 = vsel %vm861_vm15, %v1888_v38, %v860_v58  ;;  %v1001_v23 = vmul.f32 0.5, %v1000_v32  ;;  %v916_v26 = vmul.f32 %v1457_v24, %v915_v35  ;;  %vm1007_vm15 = vcmp.eq.f32.partialorder %v1900_v60, 0.0 }
  0xf9   : > { %v1955_v20 = vsel %vm863_vm6, %v864_v22, %v862_v30  ;;  %v910_v37 = vsel %vm909_vm13, %v1890_v40, %v908_v57  ;;  %v954_v41 = vsub.f32 1.5, %v953_v33  ;;  %v869_v42 = vmul.f32 0.5, %v868_v34 }
  0xfa   : > { %v1963_v39 = vsel %vm911_vm14, %v912_v45, %v910_v37  ;;  %v1002_v46 = vsub.f32 1.5, %v1001_v23  ;;  %vm1005_vm6 = vcmp.eq.f32.partialorder %v1900_v60, inf  ;;  %v917_v48 = vmul.f32 0.5, %v916_v26  ;;  %v1459_v55 = vpop.eup %1458  ;;  %v684_v37 = vpop.f32.mrf.mxu3 }
  0xfb   : > { %v955_v38 = vmul.f32 %v1451_v43, %v954_v41  ;;  %v870_v22 = vsub.f32 1.5, %v869_v42  ;;  %v1008_v40 = vand.u32 2147483648, %v1900_v60  ;;  %vm873_vm13 = vcmp.eq.f32.partialorder %v1906_v0, inf  ;;  %v663_v26 = vpop.f32.mrf.mxu1 }
  0xfc   : > { %v1003_v49 = vmul.f32 %v1453_v47, %v1002_v46  ;;  %v828_v45 = vsub.f32 %v1922_v31, %v812_v56  ;;  %v918_v54 = vsub.f32 1.5, %v917_v48  ;;  %1462 = vrsqrt.f32 %v1946_v61 }
  0xfd   : > { %v956_v51 = vmul.f32 %v955_v38, %v1898_v59  ;;  %v871_v53 = vmul.f32 %v1455_v52, %v870_v22  ;;  %vm875_vm14 = vcmp.eq.f32.partialorder %v1906_v0, 0.0  ;;  %v876_v47 = vand.u32 2147483648, %v1906_v0  ;;  %v1461_v33 = vpop.eup %1460 }
  0xfe   : > { %v1004_v43 = vmul.f32 %v1003_v49, %v1900_v60  ;;  %v919_v58 = vmul.f32 %v1457_v24, %v918_v54  ;;  %v963_v52 = vmul.f32 %v1459_v55, %v1940_v21  ;;  %v1990_v32 = vmax.f32 %v828_v45, 0.0 }
  0xff   : > { %v958_v31 = vsel %vm957_vm3, %v1898_v59, %v956_v51  ;;  %v872_v56 = vmul.f32 %v871_v53, %v1906_v0  ;;  %v816_v30 = vmul.f32 2.0, %v672_v50  ;;  %v924_v41 = vand.u32 2147483648, %v1913_v25 }
 0x100   : > { %v1985_v19 = vsel %vm959_vm11, %v960_v44, %v958_v31  ;;  %v1006_v57 = vsel %vm1005_vm6, %v1900_v60, %v1004_v43  ;;  %v920_v59 = vmul.f32 %v919_v58, %v1913_v25  ;;  %v964_v35 = vmul.f32 %v1459_v55, %v963_v52  ;;  %v651_v60 = vpop.f32.mrf.mxu0  ;;  %v675_v31 = vpop.f32.mrf.mxu2 }
 0x101   : > { %v1994_v34 = vsel %vm1007_vm15, %v1008_v40, %v1006_v57  ;;  %v874_v24 = vsel %vm873_vm13, %v1906_v0, %v872_v56  ;;  %v1011_v42 = vmul.f32 %v1461_v33, %v1944_v28  ;;  %1464 = vrsqrt.f32 %v1990_v32 }
 0x102   : > { %v2002_v23 = vsel %vm875_vm14, %v876_v47, %v874_v24  ;;  %v1463_v44 = vpop.eup %1462  ;;  %v804_v46 = vadd.f32 %v1884_v27, %v780_v63  ;;  %v922_v38 = vsel %vm921_vm12, %v1913_v25, %v920_v59  ;;  %vm923_vm3 = vcmp.eq.f32.partialorder %v1913_v25, 0.0 }
 0x103   : > { %v965_v0 = vmul.f32 0.5, %v964_v35  ;;  %v2012_v22 = vsel %vm923_vm3, %v924_v41, %v922_v38  ;;  %v1012_v48 = vmul.f32 %v1461_v33, %v1011_v42  ;;  %v879_v49 = vmul.f32 %v1463_v44, %v1946_v61 }
 0x104   : > { %v832_v40 = vsub.f32 %v1909_v17, %v816_v30  ;;  %v820_v50 = vmul.f32 2.0, %v684_v37  ;;  %v809_v51 = vmul.f32 2.0, %v651_v60  ;;  %v813_v53 = vmul.f32 2.0, %v663_v26 }
 0x105   : > { %v966_v45 = vsub.f32 1.5, %v965_v0  ;;  %vm969_vm11 = vcmp.eq.f32.partialorder %v1940_v21, inf  ;;  %v1013_v54 = vmul.f32 0.5, %v1012_v48  ;;  %v880_v43 = vmul.f32 %v1463_v44, %v879_v49 }
 0x106   : > { %v2017_v47 = vmax.f32 %v832_v40, 0.0  ;;  %v836_v56 = vsub.f32 %v804_v46, %v820_v50  ;;  %v825_v58 = vsub.f32 %v1917_v29, %v809_v51  ;;  %v829_v52 = vsub.f32 %v1903_v62, %v813_v53  ;;  %v687_v53 = vpop.f32.mrf.mxu3 }
 0x107   : > { %v967_v25 = vmul.f32 %v1459_v55, %v966_v45  ;;  %v1465_v63 = vpop.eup %1464  ;;  %vm971_vm12 = vcmp.eq.f32.partialorder %v1940_v21, 0.0  ;;  %v1014_v17 = vsub.f32 1.5, %v1013_v54  ;;  %v881_v57 = vmul.f32 0.5, %v880_v43  ;;  %v785_v54 = vpop.permute.xlu1 %784 }
 0x108   : > { %1466 = vrsqrt.f32 %v2017_v47  ;;  %v972_v24 = vand.u32 2147483648, %v1940_v21  ;;  %v927_v59 = vmul.f32 %v1465_v63, %v1990_v32  ;;  %v817_v35 = vmul.f32 2.0, %v675_v31 }
 0x109   : > { %v968_v30 = vmul.f32 %v967_v25, %v1940_v21  ;;  %v1015_v55 = vmul.f32 %v1461_v33, %v1014_v17  ;;  %v882_v37 = vsub.f32 1.5, %v881_v57  ;;  %v2026_v41 = vmax.f32 %v836_v56, 0.0 }
 0x10a   : > { %v2028_v29 = vmax.f32 %v825_v58, 0.0  ;;  %vm1017_vm6 = vcmp.eq.f32.partialorder %v1944_v28, inf  ;;  %v928_v42 = vmul.f32 %v1465_v63, %v927_v59  ;;  %v2034_v60 = vmax.f32 %v829_v52, 0.0 }
 0x10b   : > { %v970_v62 = vsel %vm969_vm11, %v1940_v21, %v968_v30  ;;  %v1016_v33 = vmul.f32 %v1015_v55, %v1944_v28  ;;  %v883_v46 = vmul.f32 %v1463_v44, %v882_v37  ;;  %1468 = vrsqrt.f32 %v2026_v41 }
 0x10c   : > { %v2038_v26 = vsel %vm971_vm12, %v972_v24, %v970_v62  ;;  %vm1019_vm15 = vcmp.eq.f32.partialorder %v1944_v28, 0.0  ;;  %v1020_v38 = vand.u32 2147483648, %v1944_v28  ;;  %vm885_vm13 = vcmp.eq.f32.partialorder %v1946_v61, inf }
 0x10d   : > { %v929_v0 = vmul.f32 0.5, %v928_v42  ;;  %v1018_v49 = vsel %vm1017_vm6, %v1944_v28, %v1016_v33  ;;  %v884_v40 = vmul.f32 %v883_v46, %v1946_v61  ;;  %1470 = vrsqrt.f32 %v2028_v29 }
 0x10e   : > { %v1467_v48 = vpop.eup %1466  ;;  %v833_v21 = vsub.f32 %v1927_v36, %v817_v35  ;;  %v2049_v45 = vsel %vm1019_vm15, %v1020_v38, %v1018_v49  ;;  %v888_v44 = vand.u32 2147483648, %v1946_v61  ;;  %vm887_vm14 = vcmp.eq.f32.partialorder %v1946_v61, 0.0 }
 0x10f   : > { %v930_v50 = vsub.f32 1.5, %v929_v0  ;;  %v975_v51 = vmul.f32 %v1467_v48, %v2017_v47  ;;  %v886_v43 = vsel %vm885_vm13, %v1946_v61, %v884_v40  ;;  %1472 = vrsqrt.f32 %v2034_v60 }
 0x110   : > { %v2056_v28 = vsel %vm887_vm14, %v888_v44, %v886_v43  ;;  %v2058_v56 = vmax.f32 %v833_v21, 0.0  ;;  %v821_v58 = vmul.f32 2.0, %v687_v53  ;;  %v805_v52 = vadd.f32 %v1884_v27, %v785_v54 }
 0x111   : > { %v931_v31 = vmul.f32 %v1465_v63, %v930_v50  ;;  %v976_v25 = vmul.f32 %v1467_v48, %v975_v51  ;;  %v1469_v36 = vpop.eup %1468  ;;  %vm933_vm3 = vcmp.eq.f32.partialorder %v1990_v32, inf  ;;  %vm935_vm11 = vcmp.eq.f32.partialorder %v1990_v32, 0.0 }
 0x112   : > { %v1023_v30 = vmul.f32 %v1469_v36, %v2026_v41  ;;  %v936_v61 = vand.u32 2147483648, %v1990_v32  ;;  %1474 = vrsqrt.f32 %v2058_v56  ;;  %v837_v62 = vsub.f32 %v805_v52, %v821_v58 }
 0x113   : > { %v932_v17 = vmul.f32 %v931_v31, %v1990_v32  ;;  %v977_v57 = vmul.f32 0.5, %v976_v25  ;;  %v1471_v24 = vpop.eup %1470  ;;  %vm981_vm12 = vcmp.eq.f32.partialorder %v2017_v47, inf  ;;  %vm983_vm6 = vcmp.eq.f32.partialorder %v2017_v47, 0.0 }
 0x114   : > { %v1024_v35 = vmul.f32 %v1469_v36, %v1023_v30  ;;  %v891_v27 = vmul.f32 %v1471_v24, %v2028_v29  ;;  %v853_v0 = vmax.f32 %v837_v62, 0.0  ;;  %v984_v50 = vand.u32 2147483648, %v2017_v47 }
 0x115   : > { %v934_v63 = vsel %vm933_vm3, %v1990_v32, %v932_v17  ;;  %v978_v59 = vsub.f32 1.5, %v977_v57  ;;  %v1473_v55 = vpop.eup %1472  ;;  %vm1029_vm15 = vcmp.eq.f32.partialorder %v2026_v41, inf  ;;  %v1032_v17 = vand.u32 2147483648, %v2026_v41 }
 0x116   : > { %v2069_v37 = vsel %vm935_vm11, %v936_v61, %v934_v63  ;;  %v1025_v33 = vmul.f32 0.5, %v1024_v35  ;;  %v892_v46 = vmul.f32 %v1471_v24, %v891_v27  ;;  %v939_v38 = vmul.f32 %v1473_v55, %v2034_v60 }
 0x117   : > { %v979_v42 = vmul.f32 %v1467_v48, %v978_v59  ;;  %1476 = vrsqrt.f32 %v853_v0  ;;  %vm1031_vm13 = vcmp.eq.f32.partialorder %v2026_v41, 0.0  ;;  %vm897_vm14 = vcmp.eq.f32.partialorder %v2028_v29, inf }
 0x118   : > { %v1026_v40 = vsub.f32 1.5, %v1025_v33  ;;  %v893_v21 = vmul.f32 0.5, %v892_v46  ;;  %v940_v44 = vmul.f32 %v1473_v55, %v939_v38  ;;  %v1475_v32 = vpop.eup %1474  ;;  %vm899_vm3 = vcmp.eq.f32.partialorder %v2028_v29, 0.0 }
 0x119   : > { %v980_v49 = vmul.f32 %v979_v42, %v2017_v47  ;;  %v987_v31 = vmul.f32 %v1475_v32, %v2058_v56  ;;  %vm945_vm11 = vcmp.eq.f32.partialorder %v2034_v60, inf }
 0x11a   : > { %v1027_v51 = vmul.f32 %v1469_v36, %v1026_v40  ;;  %v894_v53 = vsub.f32 1.5, %v893_v21  ;;  %v941_v54 = vmul.f32 0.5, %v940_v44  ;;  %v996_v21 = vand.u32 2147483648, %v2058_v56 }
 0x11b   : > { %v982_v48 = vsel %vm981_vm12, %v2017_v47, %v980_v49  ;;  %v988_v57 = vmul.f32 %v1475_v32, %v987_v31  ;;  %vm947_vm12 = vcmp.eq.f32.partialorder %v2034_v60, 0.0 }
 0x11c   : > { %v2077_v43 = vsel %vm983_vm6, %v984_v50, %v982_v48  ;;  %v1028_v25 = vmul.f32 %v1027_v51, %v2026_v41  ;;  %v895_v58 = vmul.f32 %v1471_v24, %v894_v53  ;;  %v942_v52 = vsub.f32 1.5, %v941_v54 }
 0x11d   : > { %v1477_v61 = vpop.eup %1476  ;;  %v900_v24 = vand.u32 2147483648, %v2028_v29  ;;  %v989_v59 = vmul.f32 0.5, %v988_v57  ;;  %vm993_vm6 = vcmp.eq.f32.partialorder %v2058_v56, inf  ;;  %v1044_v53 = vand.u32 2147483648, %v853_v0 }
 0x11e   : > { %v1030_v30 = vsel %vm1029_vm15, %v2026_v41, %v1028_v25  ;;  %v896_v47 = vmul.f32 %v895_v58, %v2028_v29  ;;  %v943_v36 = vmul.f32 %v1473_v55, %v942_v52  ;;  %v1035_v62 = vmul.f32 %v1477_v61, %v853_v0 }
 0x11f   : > { %v2086_v63 = vsel %vm1031_vm13, %v1032_v17, %v1030_v30  ;;  %v948_v41 = vand.u32 2147483648, %v2034_v60  ;;  %v990_v55 = vsub.f32 1.5, %v989_v59  ;;  %vm995_vm15 = vcmp.eq.f32.partialorder %v2058_v56, 0.0 }
 0x120   : > { %v898_v35 = vsel %vm897_vm14, %v2028_v29, %v896_v47  ;;  %v944_v27 = vmul.f32 %v943_v36, %v2034_v60  ;;  %v1036_v46 = vmul.f32 %v1477_v61, %v1035_v62  ;;  %vm1041_vm13 = vcmp.eq.f32.partialorder %v853_v0, inf }
 0x121   : > { %v2093_v42 = vsel %vm899_vm3, %v900_v24, %v898_v35  ;;  %v991_v49 = vmul.f32 %v1475_v32, %v990_v55  ;;  %vm1043_vm14 = vcmp.eq.f32.partialorder %v853_v0, 0.0 }
 0x122   : > { %v946_v33 = vsel %vm945_vm11, %v2034_v60, %v944_v27  ;;  %v1037_v29 = vmul.f32 0.5, %v1036_v46 }
 0x123   : > { %v2099_v38 = vsel %vm947_vm12, %v948_v41, %v946_v33  ;;  %v992_v40 = vmul.f32 %v991_v49, %v2058_v56 }
 0x124   : > { %v1038_v44 = vsub.f32 1.5, %v1037_v29 }
 0x125   : > { %v994_v50 = vsel %vm993_vm6, %v2058_v56, %v992_v40 }
 0x126   : > { %v2106_v48 = vsel %vm995_vm15, %v996_v21, %v994_v50  ;;  %v1039_v60 = vmul.f32 %v1477_v61, %v1038_v44 }
 0x127   : > { %1049 = sbr.rel (%p1329_p4) target bundleno = 352 (0x160), region = 48 }
 0x128   : > { %v1040_v51 = vmul.f32 %v1039_v60, %v853_v0 }
 0x12a   : > { %v1042_v32 = vsel %vm1041_vm13, %v853_v0, %v1040_v51 }
 0x12b   : > { %v2108_v54 = vsel %vm1043_vm14, %v1044_v53, %v1042_v32 }
 0x12c   : > { %v1050_v31 = vlaneseq }
 0x12e   : > { %v1051_v25 = vshrl.u32 %v1050_v31, 7  ;;  %v2116_v56 = vand.u32 127, %v1050_v31 }
 0x130   : > { %v1052_v58 = vadd.s32 8, %v1051_v25  ;;  %v1053_v52 = vadd.s32 16, %v1051_v25  ;;  %v1054_v17 = vadd.s32 24, %v1051_v25  ;;  %v1055_v57 = vadd.s32 32, %v1051_v25 }
 0x131   : > { %vm1069_vm3 = vcmp.gt.s32.totalorder %v2116_v56, %v1051_v25  ;;  %v1056_v0 = vadd.s32 40, %v1051_v25  ;;  %v1057_v30 = vadd.s32 48, %v1051_v25  ;;  %v1058_v61 = vadd.s32 56, %v1051_v25 }
 0x132   : > { %vm1070_vm11 = vcmp.gt.s32.totalorder %v2116_v56, %v1052_v58  ;;  %vm1071_vm12 = vcmp.gt.s32.totalorder %v2116_v56, %v1053_v52  ;;  %vm1072_vm6 = vcmp.gt.s32.totalorder %v2116_v56, %v1054_v17  ;;  %vm1085_vm15 = vmand %vm577_vm5, %vm1069_vm3  ;;  %vm1073_vm14 = vcmp.gt.s32.totalorder %v2116_v56, %v1055_v57 }
 0x133   : > { %vm1086_vm13 = vmand %vm578_vm8, %vm1070_vm11  ;;  %v1101_v36 = vsel %vm1085_vm15, %v1955_v20, 0.0  ;;  %vm1074_vm3 = vcmp.gt.s32.totalorder %v2116_v56, %v1056_v0  ;;  %v1059_v62 = vadd.s32 64, %v1051_v25  ;;  %v1060_v46 = vadd.s32 72, %v1051_v25 }
 0x134   : > { %vm1087_vm2 = vmand %vm579_vm4, %vm1071_vm12  ;;  %v1102_v24 = vsel %vm1086_vm13, %v2002_v23, 0.0  ;;  %vm1075_vm12 = vcmp.gt.s32.totalorder %v2116_v56, %v1057_v30  ;;  %v1061_v21 = vadd.s32 80, %v1051_v25  ;;  %vm2380_vm13 = vcmp.eq.s32.totalorder %v1851_v11, %v1813_v1 }
 0x135   : > { %vm2135_vm9 = vmand %vm580_vm7, %vm1072_vm6  ;;  %v1103_v59 = vsel %vm1087_vm2, %v2056_v28, 0.0  ;;  %v1117_v27 = vadd.f32 %v1102_v24, %v1101_v36  ;;  %vm1076_vm2 = vcmp.gt.s32.totalorder %v2116_v56, %v1058_v61  ;;  %v1062_v51 = vadd.s32 88, %v1051_v25 }
 0x136   : > { %vm2146_vm11 = vmand %vm581_vm0, %vm1073_vm14  ;;  %v1104_v41 = vsel %vm2135_vm9, %v2093_v42, 0.0  ;;  %vm1077_vm9 = vcmp.gt.s32.totalorder %v2116_v56, %v1059_v62  ;;  %v1063_v58 = vadd.s32 96, %v1051_v25  ;;  %v1064_v0 = vadd.s32 104, %v1051_v25 }
 0x137   : > { %vm2157_vm6 = vmand %vm2368_vm1, %vm1074_vm3  ;;  %v1118_v33 = vadd.f32 %v1117_v27, %v1103_v59  ;;  %v1105_v49 = vsel %vm2146_vm11, %v1963_v39, 0.0  ;;  %vm1078_vm3 = vcmp.gt.s32.totalorder %v2116_v56, %v1060_v46  ;;  %vm2383_vm11 = vcmp.eq.s32.totalorder %v1823_v4, %v1813_v1 }
 0x138   : > { %vm2168_vm15 = vmand %vm2367_vm10, %vm1075_vm12  ;;  %v1106_v44 = vsel %vm2157_vm6, %v2012_v22, 0.0  ;;  %vm1079_vm6 = vcmp.gt.s32.totalorder %v2116_v56, %v1061_v21  ;;  %v1065_v61 = vadd.s32 112, %v1051_v25  ;;  %v1066_v35 = vadd.s32 120, %v1051_v25 }
 0x139   : > { %v1119_v40 = vadd.f32 %v1118_v33, %v1104_v41  ;;  %vm2179_vm14 = vmand %vm2380_vm13, %vm1076_vm2  ;;  %v1107_v53 = vsel %vm2168_vm15, %v2069_v37, 0.0  ;;  %vm2386_vm2 = vcmp.eq.s32.totalorder %v1863_v14, %v1813_v1  ;;  %vm1080_vm15 = vcmp.gt.s32.totalorder %v2116_v56, %v1062_v51 }
 0x13a   : > { %vm2190_vm12 = vmand %vm2383_vm11, %vm1077_vm9  ;;  %v1108_v52 = vsel %vm2179_vm14, %v2099_v38, 0.0  ;;  %vm2389_vm9 = vcmp.eq.s32.totalorder %v1859_v13, %v1813_v1  ;;  %vm1081_vm14 = vcmp.gt.s32.totalorder %v2116_v56, %v1063_v58  ;;  %vm1083_vm10 = vcmp.gt.s32.totalorder %v2116_v56, %v1065_v61 }
 0x13b   : > { %v1120_v60 = vadd.f32 %v1119_v40, %v1105_v49  ;;  %vm2201_vm13 = vmand %vm2386_vm2, %vm1078_vm3  ;;  %v1109_v30 = vsel %vm2190_vm12, %v1985_v19, 0.0  ;;  %vm2392_vm3 = vcmp.eq.s32.totalorder %v1827_v5, %v1813_v1  ;;  %vm1082_vm12 = vcmp.gt.s32.totalorder %v2116_v56, %v1064_v0 }
 0x13c   : > { %vm2212_vm11 = vmand %vm2389_vm9, %vm1079_vm6  ;;  %v1110_v24 = vsel %vm2201_vm13, %v2038_v26, 0.0  ;;  %vm2393_vm6 = vcmp.eq.s32.totalorder %v1871_v16, %v1813_v1  ;;  %vm2394_vm13 = vcmp.eq.s32.totalorder %v1867_v15, %v1813_v1 }
 0x13d   : > { %v1121_v31 = vadd.f32 %v1120_v60, %v1106_v44  ;;  %vm1096_vm2 = vmand %vm2392_vm3, %vm1080_vm15  ;;  %v1111_v27 = vsel %vm2212_vm11, %v2077_v43, 0.0  ;;  %vm1084_vm3 = vcmp.gt.s32.totalorder %v2116_v56, %v1066_v35  ;;  %vm2395_vm11 = vcmp.eq.s32.totalorder %v1839_v8, %v1813_v1 }
 0x13e   : > { %vm1097_vm9 = vmand %vm2393_vm6, %vm1081_vm14  ;;  %v1112_v41 = vsel %vm1096_vm2, %v2106_v48, 0.0  ;;  %vm2396_vm14 = vcmp.eq.s32.totalorder %v1875_v18, %v1813_v1 }
 0x13f   : > { %v1122_v57 = vadd.f32 %v1121_v31, %v1107_v53  ;;  %vm1098_vm15 = vmand %vm2394_vm13, %vm1082_vm12  ;;  %v1113_v55 = vsel %vm1097_vm9, %v1994_v34, 0.0 }
 0x140   : > { %vm1099_vm1 = vmand %vm2395_vm11, %vm1083_vm10  ;;  %v1114_v46 = vsel %vm1098_vm15, %v2049_v45, 0.0 }
 0x141   : > { %v1123_v36 = vadd.f32 %v1122_v57, %v1108_v52  ;;  %vm1100_vm2 = vmand %vm2396_vm14, %vm1084_vm3  ;;  %v1115_v29 = vsel %vm1099_vm1, %v2086_v63, 0.0 }
 0x142   : > { %v1116_v56 = vsel %vm1100_vm2, %v2108_v54, 0.0 }
 0x143   : > { %v1124_v59 = vadd.f32 %v1123_v36, %v1109_v30 }
 0x145   : > { %v1125_v62 = vadd.f32 %v1124_v59, %v1110_v24 }
 0x147   : > { %v1126_v25 = vadd.f32 %v1125_v62, %v1111_v27 }
 0x149   : > { %v1127_v33 = vadd.f32 %v1126_v25, %v1112_v41 }
 0x14b   : > { %v1128_v49 = vadd.f32 %v1127_v33, %v1113_v55 }
 0x14d   : > { %v1129_v40 = vadd.f32 %v1128_v49, %v1114_v46 }
 0x14f   : > { %v1130_v21 = vadd.f32 %v1129_v40, %v1115_v29 }
 0x151   : > { %v1131_v44 = vadd.f32 %v1130_v21, %v1116_v56 }
 0x153   : > { %v1132_v50 = vrot.slane %v1131_v44, 4 }
 0x155   : > { %v1133_v60 = vadd.f32 %v1132_v50, %v1131_v44 }
 0x157   : > { %v1134_v51 = vrot.slane %v1133_v60, 2 }
 0x159   : > { %v1135_v53 = vadd.f32 %v1134_v51, %v1133_v60 }
 0x15b   : > { %v1136_v32 = vrot.slane %v1135_v53, 1 }
 0x15d   : > { %v1137_v31 = vadd.f32 %v1136_v32, %v1135_v53 }
 0x15f   : > { %1138 = vst [vmem:[%s2112_s27] sm:$0x1] %v1137_v31 }
 0x160 PF: > { %p1330_p5 = scmp.eq.s32.totalorder %s1697_s30, %s1700_s9 }
 0x162   : > { %1142 = sbr.rel (%p1330_p5) target bundleno = 405 (0x195), region = 52 }
 0x167   : > { %v1143_v58 = vsel %vm577_vm5, %v1955_v20, 0.0  ;;  %v1144_v52 = vsel %vm578_vm8, %v2002_v23, 0.0  ;;  %v1145_v17 = vsel %vm579_vm4, %v2056_v28, 0.0  ;;  %v1146_v0 = vsel %vm580_vm7, %v2093_v42, 0.0 }
 0x168   : > { %v1160_v57 = vadd.f32 %v1144_v52, %v1143_v58  ;;  %v1147_v7 = vsel %vm581_vm0, %v1963_v39, 0.0  ;;  %vm2397_vm1 = vcmp.eq.s32.totalorder %v1819_v3, %v1813_v1  ;;  %vm2398_vm4 = vcmp.eq.s32.totalorder %v1855_v12, %v1813_v1 }
 0x169   : > { %v1148_v10 = vsel %vm2397_vm1, %v2012_v22, 0.0  ;;  %v1149_v23 = vsel %vm2398_vm4, %v2069_v37, 0.0  ;;  %vm2399_vm5 = vcmp.eq.s32.totalorder %v1851_v11, %v1813_v1  ;;  %vm2400_vm0 = vcmp.eq.s32.totalorder %v1823_v4, %v1813_v1 }
 0x16a   : > { %v1161_v30 = vadd.f32 %v1160_v57, %v1145_v17  ;;  %v1150_v28 = vsel %vm2399_vm5, %v2099_v38, 0.0  ;;  %v1151_v39 = vsel %vm2400_vm0, %v1985_v19, 0.0  ;;  %vm2401_vm7 = vcmp.eq.s32.totalorder %v1863_v14, %v1813_v1 }
 0x16b   : > { %v1152_v22 = vsel %vm2401_vm7, %v2038_v26, 0.0  ;;  %vm2402_vm8 = vcmp.eq.s32.totalorder %v1859_v13, %v1813_v1  ;;  %vm2403_vm10 = vcmp.eq.s32.totalorder %v1827_v5, %v1813_v1  ;;  %vm2404_vm12 = vcmp.eq.s32.totalorder %v1871_v16, %v1813_v1 }
 0x16c   : > { %v1162_v20 = vadd.f32 %v1161_v30, %v1146_v0  ;;  %v1153_v37 = vsel %vm2402_vm8, %v2077_v43, 0.0  ;;  %v1154_v42 = vsel %vm2403_vm10, %v2106_v48, 0.0  ;;  %v1155_v14 = vsel %vm2404_vm12, %v1994_v34, 0.0 }
 0x16d   : > { %vm2405_vm6 = vcmp.eq.s32.totalorder %v1867_v15, %v1813_v1  ;;  %vm2406_vm9 = vcmp.eq.s32.totalorder %v1839_v8, %v1813_v1  ;;  %vm2407_vm13 = vcmp.eq.s32.totalorder %v1875_v18, %v1813_v1 }
 0x16e   : > { %v1163_v6 = vadd.f32 %v1162_v20, %v1147_v7  ;;  %v1156_v13 = vsel %vm2405_vm6, %v2049_v45, 0.0  ;;  %v1157_v5 = vsel %vm2406_vm9, %v2086_v63, 0.0  ;;  %v1158_v16 = vsel %vm2407_vm13, %v2108_v54, 0.0  ;;  %v1159_v45 = vld [vmem:[%s2112_s27] sm:$0x1] }
 0x170   : > { %v1164_v9 = vadd.f32 %v1163_v6, %v1148_v10 }
 0x172   : > { %v1165_v2 = vadd.f32 %v1164_v9, %v1149_v23 }
 0x174   : > { %v1166_v3 = vadd.f32 %v1165_v2, %v1150_v28 }
 0x176   : > { %v1167_v12 = vadd.f32 %v1166_v3, %v1151_v39 }
 0x178   : > { %v1168_v11 = vadd.f32 %v1167_v12, %v1152_v22 }
 0x17a   : > { %v1169_v4 = vadd.f32 %v1168_v11, %v1153_v37 }
 0x17c   : > { %v1170_v19 = vadd.f32 %v1169_v4, %v1154_v42 }
 0x17e   : > { %v1171_v26 = vadd.f32 %v1170_v19, %v1155_v14 }
 0x180   : > { %v1172_v43 = vadd.f32 %v1171_v26, %v1156_v13 }
 0x182   : > { %v1173_v34 = vadd.f32 %v1172_v43, %v1157_v5 }
 0x184   : > { %v1174_v38 = vadd.f32 %v1173_v34, %v1158_v16 }
 0x186   : > { %v1175_v48 = vrot.slane %v1174_v38, 4 }
 0x188   : > { %v1176_v47 = vadd.f32 %v1175_v48, %v1174_v38 }
 0x18a   : > { %v1177_v36 = vrot.slane %v1176_v47, 2 }
 0x18c   : > { %v1178_v15 = vadd.f32 %v1177_v36, %v1176_v47 }
 0x18e   : > { %v1179_v61 = vrot.slane %v1178_v15, 1 }
 0x190   : > { %v1180_v24 = vadd.f32 %v1179_v61, %v1178_v15 }
 0x192   : > { %v1181_v59 = vadd.f32 %v1180_v24, %v1159_v45 }
 0x194   : > { %1182 = vst [vmem:[%s2112_s27] sm:$0x1] %v1181_v59 }
 0x195 PF: > { %s1381_s30 = scalar_select %p1676_p3, [#allocation3], [#allocation7] }
 0x196   : > { %s2429_s15 = smov (!%p1676_p3, %s1574_s15), 0  ;;  %s1197_s25 = sshll.u32 %s2112_s27, 4  ;;  %s1198_s25 = int_to_ptr.vmem [resolvable:$true] %s1197_s25 }
 0x197   : > { %s1192_s9 = sld [smem:[%s1381_s30 + %s2429_s15]]  ;;  %s2408_s20 = sand.u32 1, %s1566_s14  }
 0x198   : > { %s1184_s29 = scalar_lea.sflag [#allocation6], %s2408_s20  ;;  %s1522_s15 = scalar_lea.hbm %s2365_s8, 2 }
 0x19d   : > { %s1195_s22 = scalar_lea.hbm %s2365_s8, %s1192_s9 }
 0x19e   : > { %s1199_s17 = sshll.u32 %s1195_s22, 4  ;;  %s1200_s17 = int_to_ptr.hbm [resolvable:$true] %s1199_s17 }
 0x19f   : > { %s1516_s24 = sshra.s32 %s1200_s17, 4  ;;  %s1517_s24 = int_to_ptr.hbm [resolvable:$true] %s1516_s24 }
 0x1a0   : > { %s1518_s12 = scalar_lea.hbm %s1517_s24, 1  ;;  %p1523_p10 = scmp.lt.s32.totalorder %s1517_s24, %s2365_s8 }
 0x1a1   : > { %p1519_p6 = scmp.ne.s32.totalorder %s1517_s24, %s1518_s12  ;;  %p1524_p11 = scmp.lt.s32.totalorder %s1522_s15, %s1518_s12 }
 0x1a3   : > { %p1520_p7 = pnand %p1519_p6, %p1676_p3  ;;  %p1525_p12 = por %p1524_p11, %p1523_p10 }
 0x1a5   : > { %p1521_p9 = pneg %p1520_p7 }
 0x1a7   : > { %p1526_p13 = pnand %p1525_p12, %p1521_p9 }
 0x1a9   : > { %1529 = shalt.err (!%p1526_p13)
}
 0x1aa   : > { %1383 = dma.vmem_to_hbm [thread:$0]  (%p1676_p3), %s1198_s25, 16, %s1200_s17, %s1184_s29  }
 0x1ab PF: > { %p1389_p0 = scmp.ge.s32.totalorder %s1582_s16, 2  ;;  %s1211_s9 = sand.u32 1, %s1562_s13  }
 0x1ac   : > { %s1212_s11 = scalar_lea.sflag [#allocation6], %s1211_s9 }
 0x1ad   : > { %p1386_p1 = pnand %p1389_p0, %p1685_p8 }
 0x1af   : > { %p1387_p2 = pneg %p1386_p1 }
 0x1b1   : > { %1557 = dma.done.wait (%p1387_p2), %s1212_s11, 16  }
 0x1b2   : > { %1559 = vsyncadd (%p1387_p2), %s1212_s11, 4294967280  ;;  %s34_s16 = sadd.s32 1, %s1582_s16   ;;  %s2409_s13 = smov %s1566_s14 }
 0x1b3   : > { %p31_p4 = scmp.ge.s32.totalorder %s34_s16, 5   ;;  %s2410_s14 = smov %s1570_s0 }
 0x1b4   : > { %s2411_s0 = smov %s1691_s26  ;;  %s2412_s15 = smov %s1578_s1 }
 0x1b5   : > { %s2413_s1 = smov %s2415_s19  ;;  %33 = sbr.rel (!%p31_p4) target bundleno = 11 (0xb), region = 102 }
 0x1ba   :  { %1217 = vsyncpa [#allocation6], 1 }
 0x1bb   :  { %1219 = vsyncpa [#allocation6 + $0x1], 1 }

</bundles_post_ra>
